<compile_context>
chip_gen: v7x
topology: tpu7x:2x2x1
jax: 0.10.0
libtpu: 0.0.40
codegen_flags: <defaults>
</compile_context>

<pallas_src>
import math

import jax
import jax.numpy as jnp
from jax.experimental import pallas as pl
from jax.experimental.pallas import tpu as pltpu


def _round_up(x, m):
    return (x + m - 1) // m * m


def _cdiv(a, b):
    return (a + b - 1) // b


def _pick_tf(f_in, cap=2048):
    """Largest multiple of 128 <= cap that divides F (avoids padding the image
    along the contraction axis); falls back to a padded tile otherwise."""
    cap = max(128, min(cap, _round_up(f_in, 128)))
    cap -= cap % 128
    for tf in range(cap, 0, -128):
        if f_in % tf == 0:
            return tf
    return cap


def _vmem_bytes(tb, tf, d_pad, k_pad):
    # double-buffered: x (f32) + wv (bf16) + txt (bf16, constant) + out (f32),
    # plus the resident f32 feature-accumulator scratch.
    return (2 * tb * tf * 4 + 2 * tf * d_pad * 2 + 2 * d_pad * k_pad * 2
            + 2 * tb * k_pad * 4 + tb * d_pad * 4)


def _clip_logits_kernel(x_ref, wv_ref, txt_ref, out_ref, acc_ref):
    # x_ref  : VMEM (TB, TF)     f32   -- flattened NCHW image tile
    # wv_ref : VMEM (TF, D_pad)  bf16  -- visual-projection tile (F slice)
    # txt_ref: VMEM (D_pad, Kp)  bf16  -- pre-normalized, exp(logit_scale)-
    #                                     scaled, pre-transposed text features
    # out_ref: VMEM (TB, Kp)     f32   -- logits tile (resident across k)
    # acc_ref: VMEM (TB, D_pad)  f32   -- image-feature accumulator scratch
    k = pl.program_id(1)

    @pl.when(k == 0)
    def _():
        acc_ref[...] = jnp.zeros_like(acc_ref)

    # Partial contraction over this F tile; the image is cast to bf16 on the
    # fly (bf16 MXU operands, f32 accumulation).
    acc_ref[...] += jnp.dot(x_ref[...].astype(jnp.bfloat16), wv_ref[...],
                            preferred_element_type=jnp.float32)

    @pl.when(k == pl.num_programs(1) - 1)
    def _():
        feats = acc_ref[...]
        # L2-normalize in f32 (v5e VPU/EUP have no bf16).  Tiny eps guard so
        # all-zero rows (batch padding / a genuinely zero image) give zero
        # logits instead of NaN; negligible vs. the eps-free CLIP reference.
        inv_norm = jax.lax.rsqrt(
            jnp.maximum(jnp.sum(feats * feats, axis=-1, keepdims=True), 1e-12))
        feats_bf16 = (feats * inv_norm).astype(jnp.bfloat16)
        # logits = feats @ (exp(logit_scale) * normalized_text).T — the text
        # operand arrives pre-transposed (D_pad, Kp): no in-kernel transpose.
        out_ref[...] = jnp.dot(
            feats_bf16, txt_ref[...],
            preferred_element_type=jnp.float32).astype(out_ref.dtype)


def prepare_clip_params(w_visual, text_features, logit_scale, *, tf=None):
    """One-time parameter prep, hoisted out of the per-call forward path."""
    f_in, d = w_visual.shape
    k, d2 = text_features.shape
    assert d2 == d

    if tf is None:
        tf = _pick_tf(f_in)
    assert tf % 128 == 0
    f_pad = _round_up(f_in, tf)
    d_pad = _round_up(d, 128)     # lane-dense feature dim
    k_pad = _round_up(k, 128)     # lane-dense logits (full vst, not masked)

    # Visual weight: bf16, padded once (read many times by the kernel).
    wv = jnp.pad(w_visual.astype(jnp.bfloat16),
                 ((0, f_pad - f_in), (0, d_pad - d)))

    # Text features: normalize (f32), fold exp(logit_scale), transpose to
    # (D, K), pad, cast to bf16 — all once here.
    txt = text_features.astype(jnp.float32)
    txt = txt * jax.lax.rsqrt(jnp.sum(txt * txt, axis=-1, keepdims=True))
    txt_t = (jnp.exp(jnp.asarray(logit_scale, jnp.float32)) * txt).T  # (D, K)
    txt_t = jnp.pad(txt_t,
                    ((0, d_pad - d), (0, k_pad - k))).astype(jnp.bfloat16)

    # Generation-aware VMEM budget (96 MiB on 128 MiB v5e/v6e, 48 MiB on
    # 64 MiB v7x).
    try:
        vmem_cap = int(pltpu.get_tpu_info().vmem_capacity_bytes)
    except Exception:
        vmem_cap = 64 * 1024 * 1024
    vmem_limit = min(vmem_cap * 3 // 4, 112 * 1024 * 1024)

    return {
        "wv": wv, "txt_t": txt_t,
        "f_in": f_in, "f_pad": f_pad, "tf": tf,
        "d": d, "d_pad": d_pad, "k": k, "k_pad": k_pad,
        "vmem_limit": int(vmem_limit),
    }


def clip_forward(image_nchw, params, *, tb=None):
    """image_nchw: (B, C, H, W) f32; returns logits (B, K) f32."""
    b = image_nchw.shape[0]
    assert math.prod(image_nchw.shape[1:]) == params["f_in"]
    f_in, f_pad, tf = params["f_in"], params["f_pad"], params["tf"]
    d_pad, k_pad = params["d_pad"], params["k_pad"]

    b_pad = _round_up(b, 8)
    if tb is None:
        # Biggest batch tile up to 512: the weight tile DMA is independent of
        # tb, so larger tb raises arithmetic intensity, and for B <= 512 the
        # weight streams from HBM exactly once.
        num_b = _cdiv(b_pad, 512)
        tb = _round_up(_cdiv(b_pad, num_b), 8)
    assert tb % 8 == 0
    num_b = _cdiv(b_pad, tb)
    b_pad = num_b * tb
    # TODO(synk): on v7x (2 TensorCores) a single b-tile leaves one core idle;
    #             splitting B across cores doubles the weight HBM stream, so it
    #             only pays once the kernel is compute-bound (>~311 flop/byte).

    est = _vmem_bytes(tb, tf, d_pad, k_pad)
    assert est <= params["vmem_limit"], (est, params["vmem_limit"])

    x = image_nchw.reshape(b, f_in)            # free reshape; stays f32 in HBM
    if b_pad != b or f_pad != f_in:
        x = jnp.pad(x, ((0, b_pad - b), (0, f_pad - f_in)))

    grid = (b_pad // tb, f_pad // tf)

    logits_pad = pl.pallas_call(
        _clip_logits_kernel,
        out_shape=jax.ShapeDtypeStruct((b_pad, k_pad), jnp.float32),
        grid_spec=pltpu.PrefetchScalarGridSpec(
            num_scalar_prefetch=0,
            grid=grid,
            in_specs=[
                pl.BlockSpec((tb, tf), lambda i, k: (i, k)),        # image
                pl.BlockSpec((tf, d_pad), lambda i, k: (k, 0)),     # weight
                pl.BlockSpec((d_pad, k_pad), lambda i, k: (0, 0)),  # text (const)
            ],
            out_specs=pl.BlockSpec((tb, k_pad), lambda i, k: (i, 0)),
            scratch_shapes=[pltpu.VMEM((tb, d_pad), jnp.float32)],
        ),
        compiler_params=pltpu.CompilerParams(
            dimension_semantics=("parallel", "arbitrary"),
            vmem_limit_bytes=params["vmem_limit"],
        ),
    )(x, params["wv"], params["txt_t"])

    return logits_pad[:b, :params["k"]]


if __name__ == "__main__":
    # Small, deterministic shapes consistent with the module.
    B, C, H, W = 2, 4, 16, 16       # image batch, NCHW
    D = 32                          # CLIP embedding dim (hidden)
    K = 8                           # number of classnames

    key = jax.random.PRNGKey(0)
    k_img, k_wv, k_txt = jax.random.split(key, 3)

    image = jax.random.normal(k_img, (B, C, H, W), jnp.float32)
    w_visual = jax.random.normal(k_wv, (C * H * W, D), jnp.float32) * 0.02
    text_features = jax.random.normal(k_txt, (K, D), jnp.float32)
    # CLIP initializes logit_scale = ln(1/0.07)
    logit_scale = jnp.log(jnp.float32(1.0 / 0.07))

    # One-time (hoisted) weight/text prep; tf=512 with F=1024 exercises the
    # 2-step accumulation along the F grid axis.
    params = prepare_clip_params(w_visual, text_features, logit_scale, tf=512)
    logits = clip_forward(image, params)
    logits = jax.block_until_ready(logits)

    # Pure-JAX reference mirroring the kernel precision (bf16 MXU operands,
    # f32 accumulation, f32 normalization).
    feats = jnp.dot(image.reshape(B, -1).astype(jnp.bfloat16),
                    w_visual.astype(jnp.bfloat16),
                    preferred_element_type=jnp.float32)
    feats = feats / jnp.linalg.norm(feats, axis=-1, keepdims=True)
    txt = text_features / jnp.linalg.norm(text_features, axis=-1, keepdims=True)
    txt_s = (jnp.exp(logit_scale) * txt).astype(jnp.bfloat16)
    ref = jnp.dot(feats.astype(jnp.bfloat16), txt_s.T,
                  preferred_element_type=jnp.float32)

    assert logits.shape == (B, K)
    assert jnp.allclose(logits, ref, atol=2e-2, rtol=2e-2), (
        float(jnp.max(jnp.abs(logits - ref))))

    print("KERNEL_OK")
</pallas_src>

<mosaic_0001>
module attributes {stable_mosaic.version = 11 : i64} {
  func.func @_clip_logits_kernel(%arg0: i32, %arg1: i32, %arg2: memref<8x512xf32, #tpu.memory_space<vmem>>, %arg3: memref<512x128xbf16, #tpu.memory_space<vmem>>, %arg4: memref<128x128xbf16, #tpu.memory_space<vmem>>, %arg5: memref<8x128xf32, #tpu.memory_space<vmem>>, %arg6: memref<8x128xf32, #tpu.memory_space<vmem>>) attributes {dimension_semantics = [#tpu.dimension_semantics<parallel>, #tpu.dimension_semantics<arbitrary>], iteration_bounds = array<i64: 1, 2>, scalar_prefetch = 0 : i64, scratch_operands = 1 : i64, tpu.core_type = #tpu.core_type<tc>, window_params = [{transform_indices = @transform_0, window_bounds = array<i64: 8, 512>}, {transform_indices = @transform_1, window_bounds = array<i64: 512, 128>}, {pipeline_mode = #tpu.pipeline_mode<synchronous>, transform_indices = @transform_2, window_bounds = array<i64: 128, 128>}, {transform_indices = @transform_3, window_bounds = array<i64: 8, 128>}]} {
    %c0_i32 = arith.constant 0 : i32
    %0 = arith.cmpi eq, %arg1, %c0_i32 : i32
    %1 = arith.extui %0 : i1 to i32
    %c0_i32_0 = arith.constant 0 : i32
    %2 = arith.cmpi ne, %1, %c0_i32_0 : i32
    scf.if %2 {
      %cst_9 = arith.constant 0.000000e+00 : f32
      %13 = vector.broadcast %cst_9 : f32 to vector<8x128xf32>
      %c0_10 = arith.constant 0 : index
      %c0_11 = arith.constant 0 : index
      %14 = vector.load %arg6[%c0_10, %c0_11] : memref<8x128xf32, #tpu.memory_space<vmem>>, vector<8x128xf32>
      tpu.vector_store %arg6[%c0_10, %c0_11], %13 {strides = array<i32>} : memref<8x128xf32, #tpu.memory_space<vmem>>, vector<8x128xf32>,
    } else {
    }
    %c0 = arith.constant 0 : index
    %c0_1 = arith.constant 0 : index
    %3 = vector.load %arg6[%c0, %c0_1] : memref<8x128xf32, #tpu.memory_space<vmem>>, vector<8x128xf32>
    %c0_2 = arith.constant 0 : index
    %c0_3 = arith.constant 0 : index
    %4 = vector.load %arg2[%c0_2, %c0_3] : memref<8x512xf32, #tpu.memory_space<vmem>>, vector<8x512xf32>
    %5 = arith.truncf %4 : vector<8x512xf32> to vector<8x512xbf16>
    %c0_4 = arith.constant 0 : index
    %c0_5 = arith.constant 0 : index
    %6 = vector.load %arg3[%c0_4, %c0_5] : memref<512x128xbf16, #tpu.memory_space<vmem>>, vector<512x128xbf16>
    %cst = arith.constant dense<0.000000e+00> : vector<8x128xf32>
    %7 = tpu.matmul %5, %6, %cst {dimension_numbers = #tpu.dot_dimension_numbers<[1], [0], [0], [1], [0, 0, 1, 1], [], []>} : vector<8x512xbf16>, vector<512x128xbf16>, vector<8x128xf32> -> vector<8x128xf32>
    %8 = arith.addf %3, %7 : vector<8x128xf32>
    %c0_6 = arith.constant 0 : index
    %c0_7 = arith.constant 0 : index
    %9 = vector.load %arg6[%c0_6, %c0_7] : memref<8x128xf32, #tpu.memory_space<vmem>>, vector<8x128xf32>
    tpu.vector_store %arg6[%c0_6, %c0_7], %8 {strides = array<i32>} : memref<8x128xf32, #tpu.memory_space<vmem>>, vector<8x128xf32>,
    %c1_i32 = arith.constant 1 : i32
    %10 = arith.cmpi eq, %arg1, %c1_i32 : i32
    %11 = arith.extui %10 : i1 to i32
    %c0_i32_8 = arith.constant 0 : i32
    %12 = arith.cmpi ne, %11, %c0_i32_8 : i32
    scf.if %12 {
      %c0_9 = arith.constant 0 : index
      %c0_10 = arith.constant 0 : index
      %13 = vector.load %arg6[%c0_9, %c0_10] : memref<8x128xf32, #tpu.memory_space<vmem>>, vector<8x128xf32>
      %14 = arith.mulf %13, %13 : vector<8x128xf32>
      %cst_11 = arith.constant dense<0.000000e+00> : vector<8xf32>
      %15 = vector.multi_reduction <add>, %14, %cst_11 [1] : vector<8x128xf32> to vector<8xf32>
      %16 = vector.shape_cast %15 : vector<8xf32> to vector<8x1xf32>
      %cst_12 = arith.constant 9.99999996E-13 : f32
      %17 = vector.broadcast %cst_12 : f32 to vector<8x1xf32>
      %18 = arith.maximumf %16, %17 : vector<8x1xf32>
      %19 = math.rsqrt %18 : vector<8x1xf32>
      %20 = vector.broadcast %19 : vector<8x1xf32> to vector<8x128xf32>
      %21 = arith.mulf %13, %20 : vector<8x128xf32>
      %22 = arith.truncf %21 : vector<8x128xf32> to vector<8x128xbf16>
      %c0_13 = arith.constant 0 : index
      %c0_14 = arith.constant 0 : index
      %23 = vector.load %arg4[%c0_13, %c0_14] : memref<128x128xbf16, #tpu.memory_space<vmem>>, vector<128x128xbf16>
      %cst_15 = arith.constant dense<0.000000e+00> : vector<8x128xf32>
      %24 = tpu.matmul %22, %23, %cst_15 {dimension_numbers = #tpu.dot_dimension_numbers<[1], [0], [0], [1], [0, 0, 1, 1], [], []>} : vector<8x128xbf16>, vector<128x128xbf16>, vector<8x128xf32> -> vector<8x128xf32>
      %c0_16 = arith.constant 0 : index
      %c0_17 = arith.constant 0 : index
      %25 = vector.load %arg5[%c0_16, %c0_17] : memref<8x128xf32, #tpu.memory_space<vmem>>, vector<8x128xf32>
      tpu.vector_store %arg5[%c0_16, %c0_17], %24 {strides = array<i32>} : memref<8x128xf32, #tpu.memory_space<vmem>>, vector<8x128xf32>,
    } else {
    }
    return
  }
  func.func @transform_0(%arg0: i32, %arg1: i32) -> (i32, i32) {
    %c0_i32 = arith.constant 0 : i32
    return %arg0, %arg1 : i32, i32
  }
  func.func @transform_1(%arg0: i32, %arg1: i32) -> (i32, i32) {
    %c0_i32 = arith.constant 0 : i32
    %c0_i32_0 = arith.constant 0 : i32
    return %arg1, %c0_i32 : i32, i32
  }
  func.func @transform_2(%arg0: i32, %arg1: i32) -> (i32, i32) {
    %c0_i32 = arith.constant 0 : i32
    %c0_i32_0 = arith.constant 0 : i32
    %c0_i32_1 = arith.constant 0 : i32
    return %c0_i32, %c0_i32_0 : i32, i32
  }
  func.func @transform_3(%arg0: i32, %arg1: i32) -> (i32, i32) {
    %c0_i32 = arith.constant 0 : i32
    %c0_i32_0 = arith.constant 0 : i32
    return %arg0, %c0_i32 : i32, i32
  }
}

</mosaic_0001>

<bundles_post_ra>
// kernel: tpu_custom_call.1
= control target key start
LH: loop header
LB: loop body
LE: loop exit
PB: predicated region body
PF: predicated region fallthrough
CT: control target
= control target key end

     0   :  { %8 = vsyncpa [#allocation4], 0  ;;  %s1561_s0 = inlined_call_operand.hbm [shape: f32[8,1024], index: 0, kind: input, shape index: {}]   ;;  %s1562_s1 = inlined_call_operand.hbm [shape: bf16[1024,128], index: 1, kind: input, shape index: {}]   ;;  %s1563_s2 = inlined_call_operand.hbm [shape: bf16[128,128], index: 2, kind: input, shape index: {}]   ;;  %s1564_s3 = inlined_call_operand.hbm [shape: f32[8,128], index: 3, kind: output, shape index: {}]  }
   0x1   :  { %10 = vsyncpa [#allocation4 + $0x1], 0 }
   0x2   :  { %11 = vsyncpa [#allocation7], 0 }
   0x3   :  { %13 = vsyncpa [#allocation7 + $0x1], 0 }
   0x4   :  { %14 = vsyncpa [#allocation5], 0  ;;  %s1294_s12 = smov 0   ;;  %s1296_s13 = smov 0  }
   0x5   :  { %s1298_s14 = smov 0   ;;  %s1300_s15 = smov 0  }
   0x6   :  { %s1302_s16 = smov 0   ;;  %s1304_s17 = smov 0  }
   0x7 LB: > { %s1323_s18 = sadd.s32 4294967295, %s1263_s17   ;;  %p54_p0 = scmp.ne.s32.totalorder %s1247_s13, %s1243_s12  ;;  %s1263_s17 = sphi %s1304_s17, %s20_s17   ;;  %s1259_s16 = sphi %s1302_s16, %s1580_s16   ;;  %s1255_s15 = sphi %s1300_s15, %s1579_s15   ;;  %s1251_s14 = sphi %s1298_s14, %s1578_s14   ;;  %s1247_s13 = sphi %s1296_s13, %s1577_s13   ;;  %s1243_s12 = sphi %s1294_s12, %s1576_s12  }
   0x8   : > { %p1565_p1 = scmp.eq.s32.totalorder %s1323_s18, 0  ;;  %p828_p2 = scmp.ge.s32.totalorder %s1263_s17, 1 }
   0x9   : > { %p138_p3 = scmp.lt.s32.totalorder %s1263_s17, 3  ;;  %s1265_s21 = smov [#allocation8]  }
   0xa   : > { %p1331_p4 = por %p1565_p1, %p54_p0  ;;  %s150_s22 = sshll.u32 %s1265_s21, 4  ;;  %s151_s22 = int_to_ptr.vmem [resolvable:$true] %s150_s22 }
   0xb   : > { %p1335_p5 = pnand %p828_p2, %p138_p3  ;;  %s29_s24 = sadd.s32 1, %s1259_s16 }
   0xc   : > { %s1568_s19 = scalar_select %p1331_p4, 1, 0 }
   0xd   : > { %s1569_s20 = scalar_select %p1335_p5, 1, 0 }
   0xe   : > { %p974_p6 = pneg %p1335_p5  ;;  %s1087_s27 = scalar_lea.hbm %s1563_s2, 1024 }
   0xf   : > { %p1088_p8 = scmp.ne.s32.totalorder %s1563_s2, %s1087_s27  ;;  %p1094_p12 = scmp.lt.u32.totalorder %s1087_s27, %s1563_s2 }
  0x10   : > { %p1343_p7 = pnand %p974_p6, %p1565_p1 }
  0x12   : > { %p1089_p9 = pneg %p1343_p7 }
  0x14   : > { %p1090_p10 = pnand %p1089_p9, %p1088_p8 }
  0x16   : > { %p1091_p11 = pneg %p1090_p10 }
  0x18   : > { %p1096_p13 = pnand %p1094_p12, %p1091_p11 }
  0x1a   : > { %1099 = shalt.err (!%p1096_p13)
}
  0x1b   : > { %s1100_s5 = scalar_lea.vmem %s151_s22, 1024  ;;  %p1108_p6 = scmp.lt.s32.totalorder %s151_s22, %s151_s22 }
  0x1c   : > { %p1101_p0 = scmp.ne.s32.totalorder %s151_s22, %s1100_s5  ;;  %p1109_p1 = scmp.lt.s32.totalorder %s1100_s5, %s1100_s5 }
  0x1e   : > { %p1103_p2 = pnand %p1101_p0, %p1089_p9  ;;  %p1110_p4 = por %p1109_p1, %p1108_p6 }
  0x20   : > { %p1104_p3 = pneg %p1103_p2 }
  0x22   : > { %p1111_p5 = pnand %p1110_p4, %p1104_p3 }
  0x24   : > { %1114 = shalt.err (!%p1111_p5)
}
  0x25   : > { %s1266_s6 = smov 64   ;;  %s1267_s7 = smov 4  }
  0x26   : > { %977 = dma.hbm_to_vmem [thread:$0]  (!%p1343_p7), %s1563_s2, 1024, %s151_s22, [#allocation7], %s1266_s6, %s1266_s6, %s1267_s7  }
  0x27   : > { %p30_p1 = scmp.ge.s32.totalorder %s29_s24, 2  ;;  %s41_s10 = sadd.s32 1, %s1251_s14 }
  0x28   : > { %p48_p4 = scmp.ne.s32.totalorder %s1251_s14, %s1247_s13  ;;  %p49_p5 = scmp.eq.s32.totalorder %s1263_s17, 0 }
  0x29   : > { %s1582_s24 = smov (%p30_p1, %s29_s24), 0  ;;  %p986_p9 = scmp.lt.s32.totalorder %s1263_s17, 2 }
  0x2a   : > { %p50_p8 = por %p49_p5, %p48_p4  ;;  %s37_s11 = ssub.s32 %s1259_s16, %s1582_s24 }
  0x2b   : > { %s1377_s12 = sand.u32 1, %s1251_s14   ;;  %p39_p10 = scmp.eq.s32.totalorder %s37_s11, 0 }
  0x2c   : > { %s831_s21 = sshll.u32 %s1377_s12, 5  ;;  %s887_s23 = sshll.u32 %s1259_s16, 9 }
  0x2d   : > { %s1382_s25 = scalar_select %p39_p10, %s1251_s14, %s41_s10  }
  0x2e   : > { %s1387_s27 = scalar_lea.hbm %s1561_s0, %s887_s23  ;;  %s168_s28 = scalar_lea.vmem [#allocation3], %s831_s21 }
  0x2f   : > { %s178_s29 = sshll.u32 %s168_s28, 4  ;;  %p1389_p7 = pnand %p986_p9, %p50_p8  ;;  %s1393_s29 = int_to_ptr.vmem [resolvable:$true] %s178_s29 }
  0x30   : > { %s834_s4 = sshll.u32 %s1377_s12, 8  ;;  %s165_s5 = scalar_lea.sflag [#allocation4], %s1377_s12 }
  0x31   : > { %s1115_s8 = scalar_lea.hbm %s1387_s27, 512  ;;  %p1117_p12 = pneg %p1389_p7 }
  0x32   : > { %p1116_p11 = scmp.ne.s32.totalorder %s1387_s27, %s1115_s8  ;;  %s1120_s11 = scalar_lea.hbm %s1561_s0, 1024 }
  0x33   : > { %p1121_p2 = scmp.lt.u32.totalorder %s1387_s27, %s1561_s0  ;;  %p1122_p3 = scmp.lt.u32.totalorder %s1120_s11, %s1115_s8 }
  0x34   : > { %p1118_p13 = pnand %p1117_p12, %p1116_p11  ;;  %p1124_p1 = scmp.lt.u32.totalorder %s1115_s8, %s1387_s27 }
  0x35   : > { %p1123_p6 = por %p1122_p3, %p1121_p2 }
  0x36   : > { %p1119_p0 = pneg %p1118_p13 }
  0x37   : > { %p1125_p4 = por %p1124_p1, %p1123_p6 }
  0x39   : > { %p1126_p5 = pnand %p1125_p4, %p1119_p0 }
  0x3b   : > { %1129 = shalt.err (!%p1126_p5)
}
  0x3c   : > { %s1130_s22 = scalar_lea.vmem %s1393_s29, 512  ;;  %s1268_s26 = smov [#allocation3]  }
  0x3d   : > { %p1131_p8 = scmp.ne.s32.totalorder %s1393_s29, %s1130_s22  ;;  %s1135_s28 = sshll.u32 %s1268_s26, 4  ;;  %s1136_s28 = int_to_ptr.vmem [resolvable:$false] %s1135_s28 }
  0x3e   : > { %s1137_s9 = scalar_lea.vmem %s1136_s28, 1024  ;;  %p1138_p11 = scmp.lt.s32.totalorder %s1393_s29, %s1136_s28 }
  0x3f   : > { %p1133_p9 = pnand %p1131_p8, %p1117_p12  ;;  %p1139_p13 = scmp.lt.s32.totalorder %s1137_s9, %s1130_s22 }
  0x41   : > { %p1134_p10 = pneg %p1133_p9  ;;  %p1140_p2 = por %p1139_p13, %p1138_p11 }
  0x43   : > { %p1141_p3 = pnand %p1140_p2, %p1134_p10 }
  0x45   : > { %1144 = shalt.err (!%p1141_p3)
}
  0x46   : > { %981 = dma.hbm_to_vmem [thread:$0]  (!%p1389_p7), %s1387_s27, 512, %s1393_s29, %s165_s5  }
  0x47   : > { %s888_s8 = sshll.u32 %s1259_s16, 12  ;;  %s189_s10 = scalar_lea.vmem [#allocation6], %s834_s4 }
  0x48   : > { %s196_s11 = sshll.u32 %s189_s10, 4  ;;  %s185_s21 = sand.u32 1, %s1263_s17   ;;  %s1425_s11 = int_to_ptr.vmem [resolvable:$true] %s196_s11 }
  0x49   : > { %s1431_s26 = scalar_lea.hbm %s1562_s1, %s888_s8  ;;  %s1433_s28 = scalar_lea.sflag [#allocation7], %s185_s21 }
  0x4a   : > { %s1145_s9 = scalar_lea.hbm %s1431_s26, 4096  ;;  %s1150_s29 = scalar_lea.hbm %s1562_s1, 8192 }
  0x4b   : > { %p1146_p0 = scmp.ne.s32.totalorder %s1431_s26, %s1145_s9  ;;  %p1151_p4 = scmp.lt.u32.totalorder %s1431_s26, %s1562_s1 }
  0x4c   : > { %p1152_p5 = scmp.lt.u32.totalorder %s1150_s29, %s1145_s9  ;;  %p1154_p9 = scmp.lt.u32.totalorder %s1145_s9, %s1431_s26 }
  0x4d   : > { %p1148_p6 = pnand %p1146_p0, %p1117_p12 }
  0x4e   : > { %p1153_p8 = por %p1152_p5, %p1151_p4 }
  0x4f   : > { %p1149_p1 = pneg %p1148_p6 }
  0x50   : > { %p1155_p10 = por %p1154_p9, %p1153_p8 }
  0x52   : > { %p1156_p11 = pnand %p1155_p10, %p1149_p1 }
  0x54   : > { %1159 = shalt.err (!%p1156_p11)
}
  0x55   : > { %s1160_s8 = scalar_lea.vmem %s1425_s11, 4096  ;;  %s1269_s10 = smov [#allocation6]  }
  0x56   : > { %p1161_p13 = scmp.ne.s32.totalorder %s1425_s11, %s1160_s8  ;;  %s1165_s21 = sshll.u32 %s1269_s10, 4  ;;  %s1166_s21 = int_to_ptr.vmem [resolvable:$false] %s1165_s21 }
  0x57   : > { %s1167_s23 = scalar_lea.vmem %s1166_s21, 8192  ;;  %p1168_p0 = scmp.lt.s32.totalorder %s1425_s11, %s1166_s21 }
  0x58   : > { %p1163_p2 = pnand %p1161_p13, %p1117_p12  ;;  %p1169_p6 = scmp.lt.s32.totalorder %s1167_s23, %s1160_s8 }
  0x5a   : > { %p1164_p3 = pneg %p1163_p2  ;;  %p1170_p4 = por %p1169_p6, %p1168_p0 }
  0x5c   : > { %p1171_p5 = pnand %p1170_p4, %p1164_p3 }
  0x5e   : > { %1174 = shalt.err (!%p1171_p5)
}
  0x5f   : > { %984 = dma.hbm_to_vmem [thread:$0]  (!%p1389_p7), %s1431_s26, 4096, %s1425_s11, %s1433_s28, %s1266_s6, %s1266_s6, %s1267_s7  }
  0x60   : > { %p1572_p12 = scmp.ne.s32.totalorder %s1569_s20, 0 }
  0x61   : > { %s210_s22 = sand.u32 (!%p1572_p12), 1, %s1247_s13   ;;  %p1573_p1 = scmp.ne.s32.totalorder (!%p1572_p12), %s1568_s19, 0 }
  0x62   : > { %208 = sbr.rel (%p1572_p12) target bundleno = 784 (0x310), region = 32  ;;  %s838_s9 = sshll.u32 (!%p1572_p12), %s210_s22, 5 }
  0x63   : > { %s211_s12 = scalar_lea.sflag (!%p1572_p12), [#allocation4], %s210_s22  ;;  %s1465_s27 = scalar_lea.vmem (!%p1572_p12), [#allocation3], %s838_s9 }
  0x69   : > { %1226 = dma.done.wait (%p1573_p1), %s211_s12, 512  }
  0x6a   : > { %1228 = vsyncadd (%p1573_p1), %s211_s12, 4294966784  ;;  %s219_s30 = sand.u32 1, %s1323_s18   ;;  %s839_s29 = sshll.u32 %s210_s22, 8 }
  0x6b   : > { %s220_s6 = scalar_lea.sflag [#allocation7], %s219_s30  ;;  %s1472_s7 = scalar_lea.vmem [#allocation6], %s839_s29 }
  0x6c   : > { %1230 = dma.done.wait (%p1573_p1), %s220_s6, 4096  }
  0x6d   : > { %1232 = vsyncadd (%p1573_p1), %s220_s6, 4294963200  ;;  %p1574_p7 = scmp.eq.s32.totalorder %s1323_s18, 0 }
  0x6f   : > { %1234 = dma.done.wait (%p1574_p7), [#allocation7], 1024   ;;  %p1575_p8 = pmov %p1574_p7 }
  0x70   : > { %p841_p9 = scmp.ne.s32.totalorder %s1255_s15, 0 }
  0x71   : > { %1236 = vsyncadd (%p1575_p8), [#allocation7], 4294966272  ;;  %v1270_v0 = vmov (!%p841_p9), 0.0  }
  0x72   : > { %256 = sbr.rel (%p841_p9) target bundleno = 121 (0x79), region = 48  ;;  %257 = vst [vmem:[#allocation2] sm:$0xff] (!%p841_p9), %v1270_v0 }
  0x79 PF: > { %v1045_v1 = vld [vmem:[%s1472_s7 + $0x40] sm:$0xff]   ;;  %v1049_v5 = vld [vmem:[%s1472_s7 + $0x48] sm:$0xff]   ;;  %v1053_v9 = vld [vmem:[%s1472_s7 + $0x50] sm:$0xff]   ;;  %p874_p10 = scmp.ne.s32.totalorder %s1255_s15, 1 }
  0x7a   : > { %v1046_v2 = vld [vmem:[%s1472_s7 + $0xc0] sm:$0xff]   ;;  %889 = vmatprep.subr.bf16.mxu0 %v1045_v1  ;;  %v1050_v6 = vld [vmem:[%s1472_s7 + $0xc8] sm:$0xff]   ;;  %v1054_v10 = vld [vmem:[%s1472_s7 + $0xd0] sm:$0xff]   ;;  %v1271_v56 = vmov (!%p874_p10), 0.0   ;;  %vm1272_vm0 = vmmov (!%p874_p10), 0  }
  0x7b   : > { %v1047_v3 = vld [vmem:[%s1472_s7] sm:$0xff]   ;;  %911 = vmatprep.subr.bf16.mxu1 %v1046_v2  ;;  %v1051_v7 = vld [vmem:[%s1472_s7 + $0x8] sm:$0xff]   ;;  %v1055_v11 = vld [vmem:[%s1472_s7 + $0x10] sm:$0xff]  }
  0x7c   : > { %v1048_v4 = vld [vmem:[%s1472_s7 + $0x80] sm:$0xff]   ;;  %890 = vmatpush3.bf16.msra.mxu0 %v1047_v3  ;;  %v1052_v8 = vld [vmem:[%s1472_s7 + $0x88] sm:$0xff]   ;;  %v1056_v12 = vld [vmem:[%s1472_s7 + $0x90] sm:$0xff]  }
  0x7d   : > { %912 = vmatpush3.bf16.msra.mxu1 %v1048_v4  ;;  %891 = vmatprep.subr.bf16.mxu0 %v1049_v5  ;;  %v1057_v13 = vld [vmem:[%s1472_s7 + $0x58] sm:$0xff]   ;;  %v1061_v17 = vld [vmem:[%s1472_s7 + $0x60] sm:$0xff]   ;;  %v1065_v21 = vld [vmem:[%s1472_s7 + $0x68] sm:$0xff]  }
  0x7e   : > { %913 = vmatprep.subr.bf16.mxu1 %v1050_v6  ;;  %v1058_v14 = vld [vmem:[%s1472_s7 + $0xd8] sm:$0xff]   ;;  %v1062_v18 = vld [vmem:[%s1472_s7 + $0xe0] sm:$0xff]   ;;  %v1066_v22 = vld [vmem:[%s1472_s7 + $0xe8] sm:$0xff]  }
  0x7f   : > { %v1059_v15 = vld [vmem:[%s1472_s7 + $0x18] sm:$0xff]   ;;  %v1063_v19 = vld [vmem:[%s1472_s7 + $0x20] sm:$0xff]   ;;  %v1067_v23 = vld [vmem:[%s1472_s7 + $0x28] sm:$0xff]  }
  0x80   : > { %892 = vmatpush3.bf16.msra.mxu0 %v1051_v7  ;;  %v1060_v16 = vld [vmem:[%s1472_s7 + $0x98] sm:$0xff]   ;;  %v1064_v20 = vld [vmem:[%s1472_s7 + $0xa0] sm:$0xff]   ;;  %v1068_v24 = vld [vmem:[%s1472_s7 + $0xa8] sm:$0xff]  }
  0x81   : > { %914 = vmatpush3.bf16.msra.mxu1 %v1052_v8  ;;  %893 = vmatprep.subr.bf16.mxu0 %v1053_v9  ;;  %v1069_v25 = vld [vmem:[%s1472_s7 + $0x70] sm:$0xff]   ;;  %v1073_v29 = vld [vmem:[%s1472_s7 + $0x78] sm:$0xff]   ;;  %v260_v33 = vld [vmem:[%s1465_s27 + $0x8] sm:$0xff] }
  0x82   : > { %915 = vmatprep.subr.bf16.mxu1 %v1054_v10  ;;  %v1070_v26 = vld [vmem:[%s1472_s7 + $0xf0] sm:$0xff]   ;;  %v1074_v30 = vld [vmem:[%s1472_s7 + $0xf8] sm:$0xff]   ;;  %v259_v35 = vld [vmem:[%s1465_s27] sm:$0xff]  ;;  %v264_v36 = vpack.c.bf16 %v260_v33, %v260_v33 }
  0x83   : > { %v1071_v27 = vld [vmem:[%s1472_s7 + $0x30] sm:$0xff]   ;;  %v1075_v31 = vld [vmem:[%s1472_s7 + $0x38] sm:$0xff]   ;;  %v263_v38 = vpack.c.bf16 %v259_v35, %v259_v35  ;;  %v1077_v57 = vld [vmem:[#allocation8] sm:$0xff] (!%p874_p10)  }
  0x84   : > { %894 = vmatpush3.bf16.msra.mxu0 %v1055_v11  ;;  %v1072_v28 = vld [vmem:[%s1472_s7 + $0xb0] sm:$0xff]   ;;  %v1076_v32 = vld [vmem:[%s1472_s7 + $0xb8] sm:$0xff]   ;;  %555 = vmatprep.mubr.bf16.mxu0 %v264_v36  ;;  %v1078_v58 = vld [vmem:[#allocation8 + $0x8] sm:$0xff] (!%p874_p10)  }
  0x85   : > { %916 = vmatpush3.bf16.msra.mxu1 %v1056_v12  ;;  %895 = vmatprep.subr.bf16.mxu0 %v1057_v13  ;;  %v262_v34 = vld [vmem:[%s1465_s27 + $0x18] sm:$0xff]  ;;  %v261_v39 = vld [vmem:[%s1465_s27 + $0x10] sm:$0xff]  ;;  %v1081_v61 = vld [vmem:[#allocation8 + $0x20] sm:$0xff] (!%p874_p10)  }
  0x86   : > { %917 = vmatprep.subr.bf16.mxu1 %v1058_v14  ;;  %v266_v37 = vpack.c.bf16 %v262_v34, %v262_v34  ;;  %v265_v40 = vpack.c.bf16 %v261_v39, %v261_v39  ;;  %v258_v49 = vld [vmem:[#allocation2] sm:$0xff]  ;;  %v1079_v59 = vld [vmem:[#allocation8 + $0x10] sm:$0xff] (!%p874_p10)   ;;  %v1082_v62 = vld [vmem:[#allocation8 + $0x28] sm:$0xff] (!%p874_p10)  }
  0x87   : > { %v1080_v60 = vld [vmem:[#allocation8 + $0x18] sm:$0xff] (!%p874_p10)   ;;  %v1083_v63 = vld [vmem:[#allocation8 + $0x30] sm:$0xff] (!%p874_p10)  }
  0x88   : > { %896 = vmatpush3.bf16.msra.mxu0 %v1059_v15  ;;  %595 = vmatprep.mubr.bf16.mxu1 %v266_v37  ;;  %v1084_v0 = vld [vmem:[#allocation8 + $0x38] sm:$0xff] (!%p874_p10)  }
  0x89   : > { %918 = vmatpush3.bf16.msra.mxu1 %v1060_v16  ;;  %897 = vmatprep.subr.bf16.mxu0 %v1061_v17 }
  0x8a   : > { %919 = vmatprep.subr.bf16.mxu1 %v1062_v18 }
  0x8c   : > { %898 = vmatpush3.bf16.msra.mxu0 %v1063_v19 }
  0x8d   : > { %920 = vmatpush3.bf16.msra.mxu1 %v1064_v20  ;;  %899 = vmatprep.subr.bf16.mxu0 %v1065_v21 }
  0x8e   : > { %921 = vmatprep.subr.bf16.mxu1 %v1066_v22 }
  0x90   : > { %900 = vmatpush3.bf16.msra.mxu0 %v1067_v23 }
  0x91   : > { %922 = vmatpush3.bf16.msra.mxu1 %v1068_v24  ;;  %901 = vmatprep.subr.bf16.mxu0 %v1069_v25 }
  0x92   : > { %923 = vmatprep.subr.bf16.mxu1 %v1070_v26 }
  0x94   : > { %902 = vmatpush3.bf16.msra.mxu0 %v1071_v27 }
  0x95   : > { %924 = vmatpush3.bf16.msra.mxu1 %v1072_v28  ;;  %903 = vmatprep.subr.bf16.mxu0 %v1073_v29 }
  0x96   : > { %925 = vmatprep.subr.bf16.mxu1 %v1074_v30 }
  0x98   : > { %904 = vmatpush3.bf16.msra.mxu0 %v1075_v31 }
  0x99   : > { %926 = vmatpush3.bf16.msra.mxu1 %v1076_v32  ;;  %942 = vmatprep.subr.bf16.mxu0 (!%p874_p10), %v1271_v56 }
  0x9b   : > { %556 = vmatmul.mubr.bf16.vlgmr.msra.gmra.mrb[0].mxu0 %v263_v38 }
  0x9c   : > { %596 = vmatmul.mubr.bf16.vlgmr.msra.gmra.mrb[0].mxu1 %v265_v40  ;;  %943 = vmatpush3.bf16.msra.mxu0 (!%p874_p10), %v1077_v57 }
  0x9d   : > { %944 = vmatprep.subr.bf16.mxu0 (!%p874_p10), %v1271_v56  ;;  %958 = vmatprep.mubr.msk.bf16.mxu0 (!%p874_p10), %vm1272_vm0, %v1271_v56 }
  0xa0   : > { %945 = vmatpush3.bf16.msra.mxu0 (!%p874_p10), %v1078_v58 }
  0xa1   : > { %946 = vmatprep.subr.bf16.mxu0 (!%p874_p10), %v1271_v56 }
  0xa4   : > { %947 = vmatpush3.bf16.msra.mxu0 (!%p874_p10), %v1079_v59 }
  0xa5   : > { %948 = vmatprep.subr.bf16.mxu0 (!%p874_p10), %v1271_v56 }
  0xa8   : > { %949 = vmatpush3.bf16.msra.mxu0 (!%p874_p10), %v1080_v60 }
  0xa9   : > { %950 = vmatprep.subr.bf16.mxu0 (!%p874_p10), %v1271_v56 }
  0xac   : > { %951 = vmatpush3.bf16.msra.mxu0 (!%p874_p10), %v1081_v61 }
  0xad   : > { %952 = vmatprep.subr.bf16.mxu0 (!%p874_p10), %v1271_v56 }
  0xb0   : > { %953 = vmatpush3.bf16.msra.mxu0 (!%p874_p10), %v1082_v62 }
  0xb1   : > { %954 = vmatprep.subr.bf16.mxu0 (!%p874_p10), %v1271_v56 }
  0xb4   : > { %955 = vmatpush3.bf16.msra.mxu0 (!%p874_p10), %v1083_v63 }
  0xb5   : > { %956 = vmatprep.subr.bf16.mxu0 (!%p874_p10), %v1271_v56 }
  0xb8   : > { %957 = vmatpush3.bf16.msra.mxu0 (!%p874_p10), %v1084_v0 }
 0x16e   : > { %v905_v41 = vpop.f32.mrb[0].mxu0 }
 0x16f   : > { %v927_v42 = vpop.f32.mrb[0].mxu1  ;;  %v906_v43 = vpop.f32.mrb[1].mxu0 }
 0x170   : > { %v928_v44 = vpop.f32.mrb[1].mxu1  ;;  %v907_v45 = vadd.f32 %v906_v43, %v905_v41  ;;  %v908_v47 = vpop.f32.mrb[2].mxu0 }
 0x171   : > { %v929_v46 = vadd.f32 %v928_v44, %v927_v42  ;;  %v930_v48 = vpop.f32.mrb[2].mxu1  ;;  %v909_v50 = vpop.f32.mrb[3].mxu0  ;;  %608 = sbr.rel (%p874_p10) target bundleno = 759 (0x2f7), region = 52 }
 0x172   : > { %v931_v51 = vpop.f32.mrb[3].mxu1 }
 0x173   : > { %v598_v52 = vadd.f32 %v929_v46, %v907_v45 }
 0x175   : > { %v603_v53 = vadd.f32 %v598_v52, %v258_v49 }
 0x177   : > { %604 = vst [vmem:[#allocation2] sm:$0xff] %v603_v53 }
 0x17e   : > { %v609_v54 = vld [vmem:[#allocation2] sm:$0xff] }
 0x17f   : > { %v610_v55 = vmul.f32 %v609_v54, %v609_v54 }
 0x181   : > { %611 = vadd.xlane.f32.xlu0 %v610_v55 }
 0x20e   : > { %v612_v1 = vpop.xlane.xlu0 %611 }
 0x20f   : > { %v613_v2 = vmax.f32 %v612_v1, 1e-12 }
 0x211   : > { %1085 = vrsqrt.f32 %v613_v2 }
 0x21b   : > { %v1086_v3 = vpop.eup %1085 }
 0x21c   : > { %v615_v4 = vmul.f32 %v1086_v3, %v609_v54 }
 0x21e   : > { %v616_v5 = vpack.c.bf16 %v615_v4, %v615_v4 }
 0x220   : > { %959 = vmatmul.mubr.bf16.vlgmr.msra.gmra.mrb[0].mxu0 %v616_v5 }
 0x2f3   : > { %v715_v6 = vpop.f32.mrb[0].mxu0 }
 0x2f4   : > { %721 = vst [vmem:[#allocation9] sm:$0xff] %v715_v6  ;;  %v960_v7 = vpop.f32.mrb[1].mxu0 }
 0x2f5   : > { %v718_v8 = vpop.f32.mrb[2].mxu0 }
 0x2f6   : > { %v961_v9 = vpop.f32.mrb[3].mxu0 }
 0x2f7 PF: > { %p988_p11 = scmp.eq.s32.totalorder %s1323_s18, 1  ;;  %s1273_s15 = smov [#allocation9]  }
 0x2f8   : > { %s731_s19 = sshll.u32 %s1273_s15, 4  ;;  %s732_s19 = int_to_ptr.vmem [resolvable:$true] %s731_s19 }
 0x2f9   : > { %s1175_s20 = scalar_lea.vmem %s732_s19, 128  ;;  %p1182_p0 = scmp.lt.s32.totalorder %s732_s19, %s732_s19 }
 0x2fa   : > { %p1176_p13 = scmp.ne.s32.totalorder %s732_s19, %s1175_s20  ;;  %p1183_p6 = scmp.lt.s32.totalorder %s1175_s20, %s1175_s20 }
 0x2fc   : > { %p1177_p2 = pnand %p1176_p13, %p988_p11  ;;  %p1184_p4 = por %p1183_p6, %p1182_p0 }
 0x2fe   : > { %p1178_p3 = pneg %p1177_p2 }
 0x300   : > { %p1185_p5 = pnand %p1184_p4, %p1178_p3 }
 0x302   : > { %1188 = shalt.err (!%p1185_p5)
}
 0x303   : > { %s1189_s28 = scalar_lea.hbm %s1564_s3, 128 }
 0x304   : > { %p1190_p12 = scmp.ne.s32.totalorder %s1564_s3, %s1189_s28  ;;  %p1195_p8 = scmp.lt.u32.totalorder %s1189_s28, %s1564_s3 }
 0x306   : > { %p1191_p1 = pnand %p1190_p12, %p988_p11 }
 0x308   : > { %p1192_p7 = pneg %p1191_p1 }
 0x30a   : > { %p1197_p9 = pnand %p1195_p8, %p1192_p7 }
 0x30c   : > { %1200 = shalt.err (!%p1197_p9)
}
 0x30d   : > { %971 = dma.vmem_to_hbm [thread:$0]  (%p988_p11), %s732_s19, 128, %s1564_s3, [#allocation5]  }
 0x30e   : > { %1238 = dma.done.wait (%p988_p11), [#allocation5], 128  }
 0x30f   : > { %1240 = vsyncadd (%p988_p11), [#allocation5], 4294967168 }
 0x310 PF: > { %s20_s17 = sadd.s32 1, %s1263_s17   ;;  %s1576_s12 = smov %s1247_s13 }
 0x311   : > { %p17_p10 = scmp.ge.s32.totalorder %s20_s17, 4   ;;  %s1577_s13 = smov %s1251_s14 }
 0x312   : > { %s1578_s14 = smov %s1382_s25  ;;  %s1579_s15 = smov %s1259_s16 }
 0x313   : > { %s1580_s16 = smov %s1582_s24  ;;  %19 = sbr.rel (!%p17_p10) target bundleno = 7 (0x7), region = 95 }
 0x31a   :  { %744 = vsyncpa [#allocation4], 1 }
 0x31b   :  { %746 = vsyncpa [#allocation4 + $0x1], 1 }
 0x31c   :  { %747 = vsyncpa [#allocation7], 1 }
 0x31d   :  { %749 = vsyncpa [#allocation7 + $0x1], 1 }
 0x31e   :  { %750 = vsyncpa [#allocation5], 1 }
 0x31f   :  { %752 = vsyncpa [#allocation5 + $0x1], 1 }

</bundles_post_ra>
